<compile_context>
chip_gen: v7x
topology: tpu7x:2x2x1
jax: 0.10.0
libtpu: 0.0.40
codegen_flags: <defaults>
</compile_context>

<pallas_src>
import functools

import jax
import jax.numpy as jnp
from jax.experimental import pallas as pl
from jax.experimental.pallas import tpu as pltpu


def _round_up(n, m):
    return ((n + m - 1) // m) * m


def _vmem_limit_bytes():
    """Raise the scoped-VMEM default but stay well below physical capacity."""
    try:
        cap = int(pltpu.get_tpu_info().vmem_capacity_bytes)
    except Exception:
        cap = 64 << 20  # assume v7x per-TensorCore capacity (most restrictive)
    # v7x (64 MiB phys) -> 48 MiB limit; v5e/v6e (128 MiB phys) -> 64 MiB limit.
    return int(min(3 * cap // 4, 64 << 20))


def _pick_batch_tile(B, K, D, C, vmem_limit):
    """Largest batch tile whose double-buffered inputs + f32 temps fit in VMEM."""
    per_row_io = 2 * (4 * K * D + 4 * K + 4)      # 2 bufs x (f32 x-row + f32 w-row + i32 label)
    per_row_tmp = 12 * 4 * D                      # live f32 (TB, D) temporaries in the k loop
    fixed = 2 * 2 * (K * C * D * 4) + 2 * C * K * 4 + 2 * 8 * 128 * 4  # resident tables + out
    budget = max(vmem_limit - fixed - (8 << 20), 8 * (per_row_io + per_row_tmp))
    tb = budget // (per_row_io + per_row_tmp)
    tb = max(8, min(512, (tb // 8) * 8))          # 512-row tiles already ~85% of HBM roofline
    tb = min(tb, _round_up(B, 8))                 # do not over-pad tiny batches
    return int(tb)


def hvcm_loss_kernel(x_ref, qc_ref, lpc_ref, ne_ref, lbl_ref, w_ref, o_ref,
                     *, alpha, beta, batch, feat_k, feat_d):
    """One batch tile.

    x_ref   : (TB, K*D)   f32   features in their natural flattened layout
    qc_ref  : (K, C, D)   f32   softmax(centers), VMEM resident (constant block)
    lpc_ref : (K, C, D)   f32   log_softmax(centers), VMEM resident
    ne_ref  : (C, K)      f32   sum_D softmax(centers)*log_softmax(centers)
    lbl_ref : (TB, 1)     int32 class label per sample
    w_ref   : (TB, K)     f32   softmax(gmm_weights), precomputed in the wrapper
    o_ref   : (1, 8, 128) f32   per-tile partial sum (broadcast across the block)
    """
    TB = x_ref.shape[0]
    C = qc_ref.shape[1]
    tile = pl.program_id(0)

    # Exact one-hot gather matrix for this tile (values are exactly 0/1, so the
    # MXU "gather" matmuls below reproduce the f32 tables exactly).
    lbl = lbl_ref[...]                                              # (TB, 1) int32
    cls_ids = jax.lax.broadcasted_iota(jnp.int32, (TB, C), 1)
    onehot = (lbl == cls_ids).astype(jnp.float32)                   # (TB, C)

    # Rows beyond the true batch (padding) contribute zero.
    row_ids = jax.lax.broadcasted_iota(jnp.int32, (TB, 1), 0)
    valid = (tile * TB + row_ids) < batch                           # (TB, 1) bool

    w = w_ref[...]                                                  # (TB, K) f32
    # Gathered -entropy of the center distributions: (TB, K).
    ne = jnp.dot(onehot, ne_ref[...], preferred_element_type=jnp.float32)

    acc = jnp.zeros((TB, 1), jnp.float32)
    # K = feat_dim[0] is small; static loop keeps every slice / matmul 2-D.
    for k in range(feat_k):
        xk = x_ref[:, k * feat_d:(k + 1) * feat_d]                  # (TB, D) f32
        # Fused gathers of the per-class tables (MXU, otherwise idle).
        qc = jnp.dot(onehot, qc_ref[k], preferred_element_type=jnp.float32)    # softmax(center)
        lpc = jnp.dot(onehot, lpc_ref[k], preferred_element_type=jnp.float32)  # log_softmax(center)

        # log-softmax(x) with a single exp pass; approx reciprocal for 1/sum.
        mx = jnp.max(xk, axis=-1, keepdims=True)
        ex = jnp.exp(xk - mx)
        sx = jnp.sum(ex, axis=-1, keepdims=True)
        log_px = (xk - mx) - jnp.log(sx)
        inv_sx = pl.reciprocal(sx, approx=True)

        # kl_x  = alpha * sum_D softmax(c) * (log_softmax(c) - log_softmax(x))
        kl_x = alpha * (ne[:, k:k + 1]
                        - jnp.sum(qc * log_px, axis=-1, keepdims=True))         # (TB, 1)
        # kl_ce = beta * sum_D softmax(x) * (log_softmax(x) - log_softmax(c))
        #       = beta * (1/sum_exp) * sum_D ex * (log_softmax(x) - log_softmax(c))
        kl_ce = beta * inv_sx * jnp.sum(ex * (log_px - lpc), axis=-1, keepdims=True)

        acc = acc + kl_x * w[:, k:k + 1] + jnp.clip(kl_x + kl_ce, 1e-5, 1e5)

    partial = jnp.sum(jnp.where(valid, acc, 0.0))
    # Lane-dense per-tile partial; final scalar reduction happens in the wrapper.
    o_ref[...] = jnp.full(o_ref.shape, partial, jnp.float32)


def hvcm_loss(centers, gmm_weights_state, gmm_weights_in, x, labels,
              *, alpha, beta, gamma):
    """Returns (total_loss, updated_gmm_weights_state). alpha/beta/gamma must be static."""
    num_classes, K, D = centers.shape
    B = x.shape[0]
    assert labels.shape[0] == B, "features.size(0) is not equal to labels.size(0)"

    # x stays in its natural flattened layout -> streamed once, no wrapper copy.
    x2 = x.reshape(B, K * D).astype(jnp.float32)

    gw = gmm_weights_in.reshape(-1, K).astype(jnp.float32)
    sm = jax.nn.softmax(gw, axis=-1)            # reused: kernel weight input + state update

    # Per-class tables (tiny): softmax / log_softmax / -entropy of the centers.
    cen = centers.astype(jnp.float32)
    qc_tab = jax.nn.softmax(cen, axis=-1)                   # (C, K, D)
    lpc_tab = jax.nn.log_softmax(cen, axis=-1)              # (C, K, D)
    negent = jnp.sum(qc_tab * lpc_tab, axis=-1)             # (C, K)
    qc_t = jnp.transpose(qc_tab, (1, 0, 2))                 # (K, C, D), VMEM resident
    lpc_t = jnp.transpose(lpc_tab, (1, 0, 2))               # (K, C, D)

    vmem_limit = _vmem_limit_bytes()
    TB = _pick_batch_tile(B, K, D, num_classes, vmem_limit)
    B_pad = _round_up(B, TB)
    pad = B_pad - B
    num_tiles = B_pad // TB

    lbl = labels.astype(jnp.int32)
    w_in = sm
    if pad:  # only for ragged batch sizes; padded rows are masked in-kernel
        x2 = jnp.pad(x2, ((0, pad), (0, 0)))
        w_in = jnp.pad(w_in, ((0, pad), (0, 0)))
        lbl = jnp.pad(lbl, ((0, pad),))
    lbl = lbl.reshape(B_pad, 1)

    kernel = functools.partial(hvcm_loss_kernel,
                               alpha=float(alpha), beta=float(beta),
                               batch=B, feat_k=K, feat_d=D)
    partials = pl.pallas_call(
        kernel,
        out_shape=jax.ShapeDtypeStruct((num_tiles, 8, 128), jnp.float32),
        grid=(num_tiles,),
        in_specs=[
            pl.BlockSpec((TB, K * D), lambda i: (i, 0)),              # x tile (streamed once)
            pl.BlockSpec((K, num_classes, D), lambda i: (0, 0, 0)),   # softmax(centers), resident
            pl.BlockSpec((K, num_classes, D), lambda i: (0, 0, 0)),   # log_softmax(centers)
            pl.BlockSpec((num_classes, K), lambda i: (0, 0)),         # -entropy table
            pl.BlockSpec((TB, 1), lambda i: (i, 0)),                  # labels tile
            pl.BlockSpec((TB, K), lambda i: (i, 0)),                  # softmax(gmm_weights) tile
        ],
        out_specs=pl.BlockSpec((1, 8, 128), lambda i: (i, 0, 0)),
        compiler_params=pltpu.CompilerParams(
            dimension_semantics=("parallel",),
            vmem_limit_bytes=vmem_limit),
    )(x2, qc_t, lpc_t, negent, lbl, w_in)

    total_loss = jnp.sum(partials[:, 0, 0]) / float(B * K)

    # In-place self.gmm_weights parameter update from the torch forward, done
    # functionally (per present class: softmax(gw[labels==cls]).mean(0)*gamma + old*(1-gamma)).
    onehot = (labels[:, None] == jnp.arange(num_classes)[None, :]).astype(jnp.float32)
    counts = onehot.sum(axis=0)                                      # (C,)
    means = (onehot.T @ sm) / jnp.maximum(counts, 1.0)[:, None]      # (C, K)
    present = (counts > 0)[:, None]
    new_state = jnp.where(present,
                          means * gamma + gmm_weights_state * (1.0 - gamma),
                          gmm_weights_state)
    return total_loss, new_state


if __name__ == "__main__":
    # Small, kernel-friendly shapes consistent with the module:
    #   num_classes=8, feat_dim=[8, 128], batch=4
    num_classes = 8
    feat_dim = [8, 128]
    B = 4
    K, D = feat_dim

    key = jax.random.PRNGKey(0)
    k_centers, k_gwparam, k_x, k_gw, k_lab = jax.random.split(key, 5)

    # Deterministic "parameters" (module __init__ shapes)
    centers = jax.random.normal(k_centers, (num_classes, K, D), dtype=jnp.float32)
    gmm_weights_state = jax.nn.softmax(
        jax.random.normal(k_gwparam, (num_classes, K), dtype=jnp.float32), axis=-1)

    # Forward inputs
    x = jax.random.normal(k_x, (B, K * D), dtype=jnp.float32)       # flattened features
    gmm_weights_in = jax.random.normal(k_gw, (B, K), dtype=jnp.float32)
    labels = jax.random.randint(k_lab, (B,), 0, num_classes)

    # args.{alpha, beta, gamma}
    alpha, beta, gamma = 1.0, 0.5, 0.9

    run = jax.jit(functools.partial(hvcm_loss, alpha=alpha, beta=beta, gamma=gamma))
    loss, new_state = run(centers, gmm_weights_state, gmm_weights_in, x, labels)
    jax.block_until_ready((loss, new_state))
    print("KERNEL_OK")
</pallas_src>

<mosaic_0001>
module attributes {stable_mosaic.version = 11 : i64} {
  func.func @hvcm_loss_kernel(%arg0: i32, %arg1: memref<8x1024xf32, #tpu.memory_space<vmem>>, %arg2: memref<8x8x128xf32, #tpu.memory_space<vmem>>, %arg3: memref<8x8x128xf32, #tpu.memory_space<vmem>>, %arg4: memref<8x8xf32, #tpu.memory_space<vmem>>, %arg5: memref<8x1xi32, #tpu.memory_space<vmem>>, %arg6: memref<8x8xf32, #tpu.memory_space<vmem>>, %arg7: memref<1x8x128xf32, #tpu.memory_space<vmem>>) attributes {dimension_semantics = [#tpu.dimension_semantics<parallel>], iteration_bounds = array<i64: 1>, scalar_prefetch = 0 : i64, scratch_operands = 0 : i64, tpu.core_type = #tpu.core_type<tc>, window_params = [{transform_indices = @transform_0, window_bounds = array<i64: 8, 1024>}, {pipeline_mode = #tpu.pipeline_mode<synchronous>, transform_indices = @transform_1, window_bounds = array<i64: 8, 8, 128>}, {pipeline_mode = #tpu.pipeline_mode<synchronous>, transform_indices = @transform_2, window_bounds = array<i64: 8, 8, 128>}, {pipeline_mode = #tpu.pipeline_mode<synchronous>, transform_indices = @transform_3, window_bounds = array<i64: 8, 8>}, {transform_indices = @transform_4, window_bounds = array<i64: 8, 1>}, {transform_indices = @transform_5, window_bounds = array<i64: 8, 8>}, {transform_indices = @transform_6, window_bounds = array<i64: 1, 8, 128>}]} {
    %c0 = arith.constant 0 : index
    %c0_0 = arith.constant 0 : index
    %0 = vector.load %arg5[%c0, %c0_0] : memref<8x1xi32, #tpu.memory_space<vmem>>, vector<8x1xi32>
    %1 = tpu.iota {dimensions = array<i32: 1>} : vector<8x8xi32>
    %2 = vector.broadcast %0 : vector<8x1xi32> to vector<8x8xi32>
    %3 = arith.cmpi eq, %2, %1 : vector<8x8xi32>
    %4 = arith.extui %3 : vector<8x8xi1> to vector<8x8xi32>
    %5 = arith.sitofp %4 : vector<8x8xi32> to vector<8x8xf32>
    %6 = tpu.iota {dimensions = array<i32: 0>} : vector<8x1xi32>
    %c8_i32 = arith.constant 8 : i32
    %7 = arith.muli %arg0, %c8_i32 : i32
    %8 = vector.broadcast %7 : i32 to vector<8x1xi32>
    %9 = arith.addi %8, %6 : vector<8x1xi32>
    %c4_i32 = arith.constant 4 : i32
    %10 = vector.broadcast %c4_i32 : i32 to vector<8x1xi32>
    %11 = arith.cmpi slt, %9, %10 : vector<8x1xi32>
    %c0_1 = arith.constant 0 : index
    %c0_2 = arith.constant 0 : index
    %12 = vector.load %arg6[%c0_1, %c0_2] : memref<8x8xf32, #tpu.memory_space<vmem>>, vector<8x8xf32>
    %c0_3 = arith.constant 0 : index
    %c0_4 = arith.constant 0 : index
    %13 = vector.load %arg4[%c0_3, %c0_4] : memref<8x8xf32, #tpu.memory_space<vmem>>, vector<8x8xf32>
    %cst = arith.constant dense<0.000000e+00> : vector<8x8xf32>
    %14 = tpu.matmul %5, %13, %cst {dimension_numbers = #tpu.dot_dimension_numbers<[1], [0], [0], [1], [0, 0, 1, 1], [], []>} : vector<8x8xf32>, vector<8x8xf32>, vector<8x8xf32> -> vector<8x8xf32>
    %cst_5 = arith.constant 0.000000e+00 : f32
    %15 = vector.broadcast %cst_5 : f32 to vector<8x1xf32>
    %c0_6 = arith.constant 0 : index
    %c0_7 = arith.constant 0 : index
    %16 = vector.load %arg1[%c0_6, %c0_7] : memref<8x1024xf32, #tpu.memory_space<vmem>>, vector<8x128xf32>
    %c0_8 = arith.constant 0 : index
    %c0_9 = arith.constant 0 : index
    %c0_10 = arith.constant 0 : index
    %17 = vector.load %arg2[%c0_8, %c0_9, %c0_10] : memref<8x8x128xf32, #tpu.memory_space<vmem>>, vector<1x8x128xf32>
    %18 = vector.shape_cast %17 : vector<1x8x128xf32> to vector<8x128xf32>
    %cst_11 = arith.constant dense<0.000000e+00> : vector<8x128xf32>
    %19 = tpu.matmul %5, %18, %cst_11 {dimension_numbers = #tpu.dot_dimension_numbers<[1], [0], [0], [1], [0, 0, 1, 1], [], []>} : vector<8x8xf32>, vector<8x128xf32>, vector<8x128xf32> -> vector<8x128xf32>
    %c0_12 = arith.constant 0 : index
    %c0_13 = arith.constant 0 : index
    %c0_14 = arith.constant 0 : index
    %20 = vector.load %arg3[%c0_12, %c0_13, %c0_14] : memref<8x8x128xf32, #tpu.memory_space<vmem>>, vector<1x8x128xf32>
    %21 = vector.shape_cast %20 : vector<1x8x128xf32> to vector<8x128xf32>
    %cst_15 = arith.constant dense<0.000000e+00> : vector<8x128xf32>
    %22 = tpu.matmul %5, %21, %cst_15 {dimension_numbers = #tpu.dot_dimension_numbers<[1], [0], [0], [1], [0, 0, 1, 1], [], []>} : vector<8x8xf32>, vector<8x128xf32>, vector<8x128xf32> -> vector<8x128xf32>
    %cst_16 = arith.constant dense<0xFF800000> : vector<8xf32>
    %23 = vector.multi_reduction <maximumf>, %16, %cst_16 [1] : vector<8x128xf32> to vector<8xf32>
    %24 = vector.shape_cast %23 : vector<8xf32> to vector<8x1xf32>
    %25 = vector.broadcast %24 : vector<8x1xf32> to vector<8x128xf32>
    %26 = arith.subf %16, %25 : vector<8x128xf32>
    %27 = math.exp %26 : vector<8x128xf32>
    %cst_17 = arith.constant dense<0.000000e+00> : vector<8xf32>
    %28 = vector.multi_reduction <add>, %27, %cst_17 [1] : vector<8x128xf32> to vector<8xf32>
    %29 = vector.shape_cast %28 : vector<8xf32> to vector<8x1xf32>
    %30 = vector.broadcast %24 : vector<8x1xf32> to vector<8x128xf32>
    %31 = arith.subf %16, %30 : vector<8x128xf32>
    %32 = math.log %29 : vector<8x1xf32>
    %33 = vector.broadcast %32 : vector<8x1xf32> to vector<8x128xf32>
    %34 = arith.subf %31, %33 : vector<8x128xf32>
    %35 = tpu.reciprocal %29 {approx = true} : vector<8x1xf32> -> vector<8x1xf32>
    %36 = vector.extract_strided_slice %14 {offsets = [0, 0], sizes = [8, 1], strides = [1, 1]} : vector<8x8xf32> to vector<8x1xf32>
    %37 = arith.mulf %19, %34 : vector<8x128xf32>
    %cst_18 = arith.constant dense<0.000000e+00> : vector<8xf32>
    %38 = vector.multi_reduction <add>, %37, %cst_18 [1] : vector<8x128xf32> to vector<8xf32>
    %39 = vector.shape_cast %38 : vector<8xf32> to vector<8x1xf32>
    %40 = arith.subf %36, %39 : vector<8x1xf32>
    %cst_19 = arith.constant 1.000000e+00 : f32
    %41 = vector.broadcast %cst_19 : f32 to vector<8x1xf32>
    %42 = arith.mulf %41, %40 : vector<8x1xf32>
    %cst_20 = arith.constant 5.000000e-01 : f32
    %43 = vector.broadcast %cst_20 : f32 to vector<8x1xf32>
    %44 = arith.mulf %43, %35 : vector<8x1xf32>
    %45 = arith.subf %34, %22 : vector<8x128xf32>
    %46 = arith.mulf %27, %45 : vector<8x128xf32>
    %cst_21 = arith.constant dense<0.000000e+00> : vector<8xf32>
    %47 = vector.multi_reduction <add>, %46, %cst_21 [1] : vector<8x128xf32> to vector<8xf32>
    %48 = vector.shape_cast %47 : vector<8xf32> to vector<8x1xf32>
    %49 = arith.mulf %44, %48 : vector<8x1xf32>
    %50 = vector.extract_strided_slice %12 {offsets = [0, 0], sizes = [8, 1], strides = [1, 1]} : vector<8x8xf32> to vector<8x1xf32>
    %51 = arith.mulf %42, %50 : vector<8x1xf32>
    %52 = arith.addf %15, %51 : vector<8x1xf32>
    %53 = arith.addf %42, %49 : vector<8x1xf32>
    %cst_22 = arith.constant 9.99999974E-6 : f32
    %cst_23 = arith.constant 1.000000e+05 : f32
    %54 = vector.broadcast %cst_22 : f32 to vector<8x1xf32>
    %55 = arith.maximumf %54, %53 : vector<8x1xf32>
    %56 = vector.broadcast %cst_23 : f32 to vector<8x1xf32>
    %57 = arith.minimumf %56, %55 : vector<8x1xf32>
    %58 = arith.addf %52, %57 : vector<8x1xf32>
    %c0_24 = arith.constant 0 : index
    %c128 = arith.constant 128 : index
    %59 = vector.load %arg1[%c0_24, %c128] : memref<8x1024xf32, #tpu.memory_space<vmem>>, vector<8x128xf32>
    %c1 = arith.constant 1 : index
    %c0_25 = arith.constant 0 : index
    %c0_26 = arith.constant 0 : index
    %60 = vector.load %arg2[%c1, %c0_25, %c0_26] : memref<8x8x128xf32, #tpu.memory_space<vmem>>, vector<1x8x128xf32>
    %61 = vector.shape_cast %60 : vector<1x8x128xf32> to vector<8x128xf32>
    %cst_27 = arith.constant dense<0.000000e+00> : vector<8x128xf32>
    %62 = tpu.matmul %5, %61, %cst_27 {dimension_numbers = #tpu.dot_dimension_numbers<[1], [0], [0], [1], [0, 0, 1, 1], [], []>} : vector<8x8xf32>, vector<8x128xf32>, vector<8x128xf32> -> vector<8x128xf32>
    %c1_28 = arith.constant 1 : index
    %c0_29 = arith.constant 0 : index
    %c0_30 = arith.constant 0 : index
    %63 = vector.load %arg3[%c1_28, %c0_29, %c0_30] : memref<8x8x128xf32, #tpu.memory_space<vmem>>, vector<1x8x128xf32>
    %64 = vector.shape_cast %63 : vector<1x8x128xf32> to vector<8x128xf32>
    %cst_31 = arith.constant dense<0.000000e+00> : vector<8x128xf32>
    %65 = tpu.matmul %5, %64, %cst_31 {dimension_numbers = #tpu.dot_dimension_numbers<[1], [0], [0], [1], [0, 0, 1, 1], [], []>} : vector<8x8xf32>, vector<8x128xf32>, vector<8x128xf32> -> vector<8x128xf32>
    %cst_32 = arith.constant dense<0xFF800000> : vector<8xf32>
    %66 = vector.multi_reduction <maximumf>, %59, %cst_32 [1] : vector<8x128xf32> to vector<8xf32>
    %67 = vector.shape_cast %66 : vector<8xf32> to vector<8x1xf32>
    %68 = vector.broadcast %67 : vector<8x1xf32> to vector<8x128xf32>
    %69 = arith.subf %59, %68 : vector<8x128xf32>
    %70 = math.exp %69 : vector<8x128xf32>
    %cst_33 = arith.constant dense<0.000000e+00> : vector<8xf32>
    %71 = vector.multi_reduction <add>, %70, %cst_33 [1] : vector<8x128xf32> to vector<8xf32>
    %72 = vector.shape_cast %71 : vector<8xf32> to vector<8x1xf32>
    %73 = vector.broadcast %67 : vector<8x1xf32> to vector<8x128xf32>
    %74 = arith.subf %59, %73 : vector<8x128xf32>
    %75 = math.log %72 : vector<8x1xf32>
    %76 = vector.broadcast %75 : vector<8x1xf32> to vector<8x128xf32>
    %77 = arith.subf %74, %76 : vector<8x128xf32>
    %78 = tpu.reciprocal %72 {approx = true} : vector<8x1xf32> -> vector<8x1xf32>
    %79 = vector.extract_strided_slice %14 {offsets = [0, 1], sizes = [8, 1], strides = [1, 1]} : vector<8x8xf32> to vector<8x1xf32>
    %80 = arith.mulf %62, %77 : vector<8x128xf32>
    %cst_34 = arith.constant dense<0.000000e+00> : vector<8xf32>
    %81 = vector.multi_reduction <add>, %80, %cst_34 [1] : vector<8x128xf32> to vector<8xf32>
    %82 = vector.shape_cast %81 : vector<8xf32> to vector<8x1xf32>
    %83 = arith.subf %79, %82 : vector<8x1xf32>
    %cst_35 = arith.constant 1.000000e+00 : f32
    %84 = vector.broadcast %cst_35 : f32 to vector<8x1xf32>
    %85 = arith.mulf %84, %83 : vector<8x1xf32>
    %cst_36 = arith.constant 5.000000e-01 : f32
    %86 = vector.broadcast %cst_36 : f32 to vector<8x1xf32>
    %87 = arith.mulf %86, %78 : vector<8x1xf32>
    %88 = arith.subf %77, %65 : vector<8x128xf32>
    %89 = arith.mulf %70, %88 : vector<8x128xf32>
    %cst_37 = arith.constant dense<0.000000e+00> : vector<8xf32>
    %90 = vector.multi_reduction <add>, %89, %cst_37 [1] : vector<8x128xf32> to vector<8xf32>
    %91 = vector.shape_cast %90 : vector<8xf32> to vector<8x1xf32>
    %92 = arith.mulf %87, %91 : vector<8x1xf32>
    %93 = vector.extract_strided_slice %12 {offsets = [0, 1], sizes = [8, 1], strides = [1, 1]} : vector<8x8xf32> to vector<8x1xf32>
    %94 = arith.mulf %85, %93 : vector<8x1xf32>
    %95 = arith.addf %58, %94 : vector<8x1xf32>
    %96 = arith.addf %85, %92 : vector<8x1xf32>
    %cst_38 = arith.constant 9.99999974E-6 : f32
    %cst_39 = arith.constant 1.000000e+05 : f32
    %97 = vector.broadcast %cst_38 : f32 to vector<8x1xf32>
    %98 = arith.maximumf %97, %96 : vector<8x1xf32>
    %99 = vector.broadcast %cst_39 : f32 to vector<8x1xf32>
    %100 = arith.minimumf %99, %98 : vector<8x1xf32>
    %101 = arith.addf %95, %100 : vector<8x1xf32>
    %c0_40 = arith.constant 0 : index
    %c256 = arith.constant 256 : index
    %102 = vector.load %arg1[%c0_40, %c256] : memref<8x1024xf32, #tpu.memory_space<vmem>>, vector<8x128xf32>
    %c2 = arith.constant 2 : index
    %c0_41 = arith.constant 0 : index
    %c0_42 = arith.constant 0 : index
    %103 = vector.load %arg2[%c2, %c0_41, %c0_42] : memref<8x8x128xf32, #tpu.memory_space<vmem>>, vector<1x8x128xf32>
    %104 = vector.shape_cast %103 : vector<1x8x128xf32> to vector<8x128xf32>
    %cst_43 = arith.constant dense<0.000000e+00> : vector<8x128xf32>
    %105 = tpu.matmul %5, %104, %cst_43 {dimension_numbers = #tpu.dot_dimension_numbers<[1], [0], [0], [1], [0, 0, 1, 1], [], []>} : vector<8x8xf32>, vector<8x128xf32>, vector<8x128xf32> -> vector<8x128xf32>
    %c2_44 = arith.constant 2 : index
    %c0_45 = arith.constant 0 : index
    %c0_46 = arith.constant 0 : index
    %106 = vector.load %arg3[%c2_44, %c0_45, %c0_46] : memref<8x8x128xf32, #tpu.memory_space<vmem>>, vector<1x8x128xf32>
    %107 = vector.shape_cast %106 : vector<1x8x128xf32> to vector<8x128xf32>
    %cst_47 = arith.constant dense<0.000000e+00> : vector<8x128xf32>
    %108 = tpu.matmul %5, %107, %cst_47 {dimension_numbers = #tpu.dot_dimension_numbers<[1], [0], [0], [1], [0, 0, 1, 1], [], []>} : vector<8x8xf32>, vector<8x128xf32>, vector<8x128xf32> -> vector<8x128xf32>
    %cst_48 = arith.constant dense<0xFF800000> : vector<8xf32>
    %109 = vector.multi_reduction <maximumf>, %102, %cst_48 [1] : vector<8x128xf32> to vector<8xf32>
    %110 = vector.shape_cast %109 : vector<8xf32> to vector<8x1xf32>
    %111 = vector.broadcast %110 : vector<8x1xf32> to vector<8x128xf32>
    %112 = arith.subf %102, %111 : vector<8x128xf32>
    %113 = math.exp %112 : vector<8x128xf32>
    %cst_49 = arith.constant dense<0.000000e+00> : vector<8xf32>
    %114 = vector.multi_reduction <add>, %113, %cst_49 [1] : vector<8x128xf32> to vector<8xf32>
    %115 = vector.shape_cast %114 : vector<8xf32> to vector<8x1xf32>
    %116 = vector.broadcast %110 : vector<8x1xf32> to vector<8x128xf32>
    %117 = arith.subf %102, %116 : vector<8x128xf32>
    %118 = math.log %115 : vector<8x1xf32>
    %119 = vector.broadcast %118 : vector<8x1xf32> to vector<8x128xf32>
    %120 = arith.subf %117, %119 : vector<8x128xf32>
    %121 = tpu.reciprocal %115 {approx = true} : vector<8x1xf32> -> vector<8x1xf32>
    %122 = vector.extract_strided_slice %14 {offsets = [0, 2], sizes = [8, 1], strides = [1, 1]} : vector<8x8xf32> to vector<8x1xf32>
    %123 = arith.mulf %105, %120 : vector<8x128xf32>
    %cst_50 = arith.constant dense<0.000000e+00> : vector<8xf32>
    %124 = vector.multi_reduction <add>, %123, %cst_50 [1] : vector<8x128xf32> to vector<8xf32>
    %125 = vector.shape_cast %124 : vector<8xf32> to vector<8x1xf32>
    %126 = arith.subf %122, %125 : vector<8x1xf32>
    %cst_51 = arith.constant 1.000000e+00 : f32
    %127 = vector.broadcast %cst_51 : f32 to vector<8x1xf32>
    %128 = arith.mulf %127, %126 : vector<8x1xf32>
    %cst_52 = arith.constant 5.000000e-01 : f32
    %129 = vector.broadcast %cst_52 : f32 to vector<8x1xf32>
    %130 = arith.mulf %129, %121 : vector<8x1xf32>
    %131 = arith.subf %120, %108 : vector<8x128xf32>
    %132 = arith.mulf %113, %131 : vector<8x128xf32>
    %cst_53 = arith.constant dense<0.000000e+00> : vector<8xf32>
    %133 = vector.multi_reduction <add>, %132, %cst_53 [1] : vector<8x128xf32> to vector<8xf32>
    %134 = vector.shape_cast %133 : vector<8xf32> to vector<8x1xf32>
    %135 = arith.mulf %130, %134 : vector<8x1xf32>
    %136 = vector.extract_strided_slice %12 {offsets = [0, 2], sizes = [8, 1], strides = [1, 1]} : vector<8x8xf32> to vector<8x1xf32>
    %137 = arith.mulf %128, %136 : vector<8x1xf32>
    %138 = arith.addf %101, %137 : vector<8x1xf32>
    %139 = arith.addf %128, %135 : vector<8x1xf32>
    %cst_54 = arith.constant 9.99999974E-6 : f32
    %cst_55 = arith.constant 1.000000e+05 : f32
    %140 = vector.broadcast %cst_54 : f32 to vector<8x1xf32>
    %141 = arith.maximumf %140, %139 : vector<8x1xf32>
    %142 = vector.broadcast %cst_55 : f32 to vector<8x1xf32>
    %143 = arith.minimumf %142, %141 : vector<8x1xf32>
    %144 = arith.addf %138, %143 : vector<8x1xf32>
    %c0_56 = arith.constant 0 : index
    %c384 = arith.constant 384 : index
    %145 = vector.load %arg1[%c0_56, %c384] : memref<8x1024xf32, #tpu.memory_space<vmem>>, vector<8x128xf32>
    %c3 = arith.constant 3 : index
    %c0_57 = arith.constant 0 : index
    %c0_58 = arith.constant 0 : index
    %146 = vector.load %arg2[%c3, %c0_57, %c0_58] : memref<8x8x128xf32, #tpu.memory_space<vmem>>, vector<1x8x128xf32>
    %147 = vector.shape_cast %146 : vector<1x8x128xf32> to vector<8x128xf32>
    %cst_59 = arith.constant dense<0.000000e+00> : vector<8x128xf32>
    %148 = tpu.matmul %5, %147, %cst_59 {dimension_numbers = #tpu.dot_dimension_numbers<[1], [0], [0], [1], [0, 0, 1, 1], [], []>} : vector<8x8xf32>, vector<8x128xf32>, vector<8x128xf32> -> vector<8x128xf32>
    %c3_60 = arith.constant 3 : index
    %c0_61 = arith.constant 0 : index
    %c0_62 = arith.constant 0 : index
    %149 = vector.load %arg3[%c3_60, %c0_61, %c0_62] : memref<8x8x128xf32, #tpu.memory_space<vmem>>, vector<1x8x128xf32>
    %150 = vector.shape_cast %149 : vector<1x8x128xf32> to vector<8x128xf32>
    %cst_63 = arith.constant dense<0.000000e+00> : vector<8x128xf32>
    %151 = tpu.matmul %5, %150, %cst_63 {dimension_numbers = #tpu.dot_dimension_numbers<[1], [0], [0], [1], [0, 0, 1, 1], [], []>} : vector<8x8xf32>, vector<8x128xf32>, vector<8x128xf32> -> vector<8x128xf32>
    %cst_64 = arith.constant dense<0xFF800000> : vector<8xf32>
    %152 = vector.multi_reduction <maximumf>, %145, %cst_64 [1] : vector<8x128xf32> to vector<8xf32>
    %153 = vector.shape_cast %152 : vector<8xf32> to vector<8x1xf32>
    %154 = vector.broadcast %153 : vector<8x1xf32> to vector<8x128xf32>
    %155 = arith.subf %145, %154 : vector<8x128xf32>
    %156 = math.exp %155 : vector<8x128xf32>
    %cst_65 = arith.constant dense<0.000000e+00> : vector<8xf32>
    %157 = vector.multi_reduction <add>, %156, %cst_65 [1] : vector<8x128xf32> to vector<8xf32>
    %158 = vector.shape_cast %157 : vector<8xf32> to vector<8x1xf32>
    %159 = vector.broadcast %153 : vector<8x1xf32> to vector<8x128xf32>
    %160 = arith.subf %145, %159 : vector<8x128xf32>
    %161 = math.log %158 : vector<8x1xf32>
    %162 = vector.broadcast %161 : vector<8x1xf32> to vector<8x128xf32>
    %163 = arith.subf %160, %162 : vector<8x128xf32>
    %164 = tpu.reciprocal %158 {approx = true} : vector<8x1xf32> -> vector<8x1xf32>
    %165 = vector.extract_strided_slice %14 {offsets = [0, 3], sizes = [8, 1], strides = [1, 1]} : vector<8x8xf32> to vector<8x1xf32>
    %166 = arith.mulf %148, %163 : vector<8x128xf32>
    %cst_66 = arith.constant dense<0.000000e+00> : vector<8xf32>
    %167 = vector.multi_reduction <add>, %166, %cst_66 [1] : vector<8x128xf32> to vector<8xf32>
    %168 = vector.shape_cast %167 : vector<8xf32> to vector<8x1xf32>
    %169 = arith.subf %165, %168 : vector<8x1xf32>
    %cst_67 = arith.constant 1.000000e+00 : f32
    %170 = vector.broadcast %cst_67 : f32 to vector<8x1xf32>
    %171 = arith.mulf %170, %169 : vector<8x1xf32>
    %cst_68 = arith.constant 5.000000e-01 : f32
    %172 = vector.broadcast %cst_68 : f32 to vector<8x1xf32>
    %173 = arith.mulf %172, %164 : vector<8x1xf32>
    %174 = arith.subf %163, %151 : vector<8x128xf32>
    %175 = arith.mulf %156, %174 : vector<8x128xf32>
    %cst_69 = arith.constant dense<0.000000e+00> : vector<8xf32>
    %176 = vector.multi_reduction <add>, %175, %cst_69 [1] : vector<8x128xf32> to vector<8xf32>
    %177 = vector.shape_cast %176 : vector<8xf32> to vector<8x1xf32>
    %178 = arith.mulf %173, %177 : vector<8x1xf32>
    %179 = vector.extract_strided_slice %12 {offsets = [0, 3], sizes = [8, 1], strides = [1, 1]} : vector<8x8xf32> to vector<8x1xf32>
    %180 = arith.mulf %171, %179 : vector<8x1xf32>
    %181 = arith.addf %144, %180 : vector<8x1xf32>
    %182 = arith.addf %171, %178 : vector<8x1xf32>
    %cst_70 = arith.constant 9.99999974E-6 : f32
    %cst_71 = arith.constant 1.000000e+05 : f32
    %183 = vector.broadcast %cst_70 : f32 to vector<8x1xf32>
    %184 = arith.maximumf %183, %182 : vector<8x1xf32>
    %185 = vector.broadcast %cst_71 : f32 to vector<8x1xf32>
    %186 = arith.minimumf %185, %184 : vector<8x1xf32>
    %187 = arith.addf %181, %186 : vector<8x1xf32>
    %c0_72 = arith.constant 0 : index
    %c512 = arith.constant 512 : index
    %188 = vector.load %arg1[%c0_72, %c512] : memref<8x1024xf32, #tpu.memory_space<vmem>>, vector<8x128xf32>
    %c4 = arith.constant 4 : index
    %c0_73 = arith.constant 0 : index
    %c0_74 = arith.constant 0 : index
    %189 = vector.load %arg2[%c4, %c0_73, %c0_74] : memref<8x8x128xf32, #tpu.memory_space<vmem>>, vector<1x8x128xf32>
    %190 = vector.shape_cast %189 : vector<1x8x128xf32> to vector<8x128xf32>
    %cst_75 = arith.constant dense<0.000000e+00> : vector<8x128xf32>
    %191 = tpu.matmul %5, %190, %cst_75 {dimension_numbers = #tpu.dot_dimension_numbers<[1], [0], [0], [1], [0, 0, 1, 1], [], []>} : vector<8x8xf32>, vector<8x128xf32>, vector<8x128xf32> -> vector<8x128xf32>
    %c4_76 = arith.constant 4 : index
    %c0_77 = arith.constant 0 : index
    %c0_78 = arith.constant 0 : index
    %192 = vector.load %arg3[%c4_76, %c0_77, %c0_78] : memref<8x8x128xf32, #tpu.memory_space<vmem>>, vector<1x8x128xf32>
    %193 = vector.shape_cast %192 : vector<1x8x128xf32> to vector<8x128xf32>
    %cst_79 = arith.constant dense<0.000000e+00> : vector<8x128xf32>
    %194 = tpu.matmul %5, %193, %cst_79 {dimension_numbers = #tpu.dot_dimension_numbers<[1], [0], [0], [1], [0, 0, 1, 1], [], []>} : vector<8x8xf32>, vector<8x128xf32>, vector<8x128xf32> -> vector<8x128xf32>
    %cst_80 = arith.constant dense<0xFF800000> : vector<8xf32>
    %195 = vector.multi_reduction <maximumf>, %188, %cst_80 [1] : vector<8x128xf32> to vector<8xf32>
    %196 = vector.shape_cast %195 : vector<8xf32> to vector<8x1xf32>
    %197 = vector.broadcast %196 : vector<8x1xf32> to vector<8x128xf32>
    %198 = arith.subf %188, %197 : vector<8x128xf32>
    %199 = math.exp %198 : vector<8x128xf32>
    %cst_81 = arith.constant dense<0.000000e+00> : vector<8xf32>
    %200 = vector.multi_reduction <add>, %199, %cst_81 [1] : vector<8x128xf32> to vector<8xf32>
    %201 = vector.shape_cast %200 : vector<8xf32> to vector<8x1xf32>
    %202 = vector.broadcast %196 : vector<8x1xf32> to vector<8x128xf32>
    %203 = arith.subf %188, %202 : vector<8x128xf32>
    %204 = math.log %201 : vector<8x1xf32>
    %205 = vector.broadcast %204 : vector<8x1xf32> to vector<8x128xf32>
    %206 = arith.subf %203, %205 : vector<8x128xf32>
    %207 = tpu.reciprocal %201 {approx = true} : vector<8x1xf32> -> vector<8x1xf32>
    %208 = vector.extract_strided_slice %14 {offsets = [0, 4], sizes = [8, 1], strides = [1, 1]} : vector<8x8xf32> to vector<8x1xf32>
    %209 = arith.mulf %191, %206 : vector<8x128xf32>
    %cst_82 = arith.constant dense<0.000000e+00> : vector<8xf32>
    %210 = vector.multi_reduction <add>, %209, %cst_82 [1] : vector<8x128xf32> to vector<8xf32>
    %211 = vector.shape_cast %210 : vector<8xf32> to vector<8x1xf32>
    %212 = arith.subf %208, %211 : vector<8x1xf32>
    %cst_83 = arith.constant 1.000000e+00 : f32
    %213 = vector.broadcast %cst_83 : f32 to vector<8x1xf32>
    %214 = arith.mulf %213, %212 : vector<8x1xf32>
    %cst_84 = arith.constant 5.000000e-01 : f32
    %215 = vector.broadcast %cst_84 : f32 to vector<8x1xf32>
    %216 = arith.mulf %215, %207 : vector<8x1xf32>
    %217 = arith.subf %206, %194 : vector<8x128xf32>
    %218 = arith.mulf %199, %217 : vector<8x128xf32>
    %cst_85 = arith.constant dense<0.000000e+00> : vector<8xf32>
    %219 = vector.multi_reduction <add>, %218, %cst_85 [1] : vector<8x128xf32> to vector<8xf32>
    %220 = vector.shape_cast %219 : vector<8xf32> to vector<8x1xf32>
    %221 = arith.mulf %216, %220 : vector<8x1xf32>
    %222 = vector.extract_strided_slice %12 {offsets = [0, 4], sizes = [8, 1], strides = [1, 1]} : vector<8x8xf32> to vector<8x1xf32>
    %223 = arith.mulf %214, %222 : vector<8x1xf32>
    %224 = arith.addf %187, %223 : vector<8x1xf32>
    %225 = arith.addf %214, %221 : vector<8x1xf32>
    %cst_86 = arith.constant 9.99999974E-6 : f32
    %cst_87 = arith.constant 1.000000e+05 : f32
    %226 = vector.broadcast %cst_86 : f32 to vector<8x1xf32>
    %227 = arith.maximumf %226, %225 : vector<8x1xf32>
    %228 = vector.broadcast %cst_87 : f32 to vector<8x1xf32>
    %229 = arith.minimumf %228, %227 : vector<8x1xf32>
    %230 = arith.addf %224, %229 : vector<8x1xf32>
    %c0_88 = arith.constant 0 : index
    %c640 = arith.constant 640 : index
    %231 = vector.load %arg1[%c0_88, %c640] : memref<8x1024xf32, #tpu.memory_space<vmem>>, vector<8x128xf32>
    %c5 = arith.constant 5 : index
    %c0_89 = arith.constant 0 : index
    %c0_90 = arith.constant 0 : index
    %232 = vector.load %arg2[%c5, %c0_89, %c0_90] : memref<8x8x128xf32, #tpu.memory_space<vmem>>, vector<1x8x128xf32>
    %233 = vector.shape_cast %232 : vector<1x8x128xf32> to vector<8x128xf32>
    %cst_91 = arith.constant dense<0.000000e+00> : vector<8x128xf32>
    %234 = tpu.matmul %5, %233, %cst_91 {dimension_numbers = #tpu.dot_dimension_numbers<[1], [0], [0], [1], [0, 0, 1, 1], [], []>} : vector<8x8xf32>, vector<8x128xf32>, vector<8x128xf32> -> vector<8x128xf32>
    %c5_92 = arith.constant 5 : index
    %c0_93 = arith.constant 0 : index
    %c0_94 = arith.constant 0 : index
    %235 = vector.load %arg3[%c5_92, %c0_93, %c0_94] : memref<8x8x128xf32, #tpu.memory_space<vmem>>, vector<1x8x128xf32>
    %236 = vector.shape_cast %235 : vector<1x8x128xf32> to vector<8x128xf32>
    %cst_95 = arith.constant dense<0.000000e+00> : vector<8x128xf32>
    %237 = tpu.matmul %5, %236, %cst_95 {dimension_numbers = #tpu.dot_dimension_numbers<[1], [0], [0], [1], [0, 0, 1, 1], [], []>} : vector<8x8xf32>, vector<8x128xf32>, vector<8x128xf32> -> vector<8x128xf32>
    %cst_96 = arith.constant dense<0xFF800000> : vector<8xf32>
    %238 = vector.multi_reduction <maximumf>, %231, %cst_96 [1] : vector<8x128xf32> to vector<8xf32>
    %239 = vector.shape_cast %238 : vector<8xf32> to vector<8x1xf32>
    %240 = vector.broadcast %239 : vector<8x1xf32> to vector<8x128xf32>
    %241 = arith.subf %231, %240 : vector<8x128xf32>
    %242 = math.exp %241 : vector<8x128xf32>
    %cst_97 = arith.constant dense<0.000000e+00> : vector<8xf32>
    %243 = vector.multi_reduction <add>, %242, %cst_97 [1] : vector<8x128xf32> to vector<8xf32>
    %244 = vector.shape_cast %243 : vector<8xf32> to vector<8x1xf32>
    %245 = vector.broadcast %239 : vector<8x1xf32> to vector<8x128xf32>
    %246 = arith.subf %231, %245 : vector<8x128xf32>
    %247 = math.log %244 : vector<8x1xf32>
    %248 = vector.broadcast %247 : vector<8x1xf32> to vector<8x128xf32>
    %249 = arith.subf %246, %248 : vector<8x128xf32>
    %250 = tpu.reciprocal %244 {approx = true} : vector<8x1xf32> -> vector<8x1xf32>
    %251 = vector.extract_strided_slice %14 {offsets = [0, 5], sizes = [8, 1], strides = [1, 1]} : vector<8x8xf32> to vector<8x1xf32>
    %252 = arith.mulf %234, %249 : vector<8x128xf32>
    %cst_98 = arith.constant dense<0.000000e+00> : vector<8xf32>
    %253 = vector.multi_reduction <add>, %252, %cst_98 [1] : vector<8x128xf32> to vector<8xf32>
    %254 = vector.shape_cast %253 : vector<8xf32> to vector<8x1xf32>
    %255 = arith.subf %251, %254 : vector<8x1xf32>
    %cst_99 = arith.constant 1.000000e+00 : f32
    %256 = vector.broadcast %cst_99 : f32 to vector<8x1xf32>
    %257 = arith.mulf %256, %255 : vector<8x1xf32>
    %cst_100 = arith.constant 5.000000e-01 : f32
    %258 = vector.broadcast %cst_100 : f32 to vector<8x1xf32>
    %259 = arith.mulf %258, %250 : vector<8x1xf32>
    %260 = arith.subf %249, %237 : vector<8x128xf32>
    %261 = arith.mulf %242, %260 : vector<8x128xf32>
    %cst_101 = arith.constant dense<0.000000e+00> : vector<8xf32>
    %262 = vector.multi_reduction <add>, %261, %cst_101 [1] : vector<8x128xf32> to vector<8xf32>
    %263 = vector.shape_cast %262 : vector<8xf32> to vector<8x1xf32>
    %264 = arith.mulf %259, %263 : vector<8x1xf32>
    %265 = vector.extract_strided_slice %12 {offsets = [0, 5], sizes = [8, 1], strides = [1, 1]} : vector<8x8xf32> to vector<8x1xf32>
    %266 = arith.mulf %257, %265 : vector<8x1xf32>
    %267 = arith.addf %230, %266 : vector<8x1xf32>
    %268 = arith.addf %257, %264 : vector<8x1xf32>
    %cst_102 = arith.constant 9.99999974E-6 : f32
    %cst_103 = arith.constant 1.000000e+05 : f32
    %269 = vector.broadcast %cst_102 : f32 to vector<8x1xf32>
    %270 = arith.maximumf %269, %268 : vector<8x1xf32>
    %271 = vector.broadcast %cst_103 : f32 to vector<8x1xf32>
    %272 = arith.minimumf %271, %270 : vector<8x1xf32>
    %273 = arith.addf %267, %272 : vector<8x1xf32>
    %c0_104 = arith.constant 0 : index
    %c768 = arith.constant 768 : index
    %274 = vector.load %arg1[%c0_104, %c768] : memref<8x1024xf32, #tpu.memory_space<vmem>>, vector<8x128xf32>
    %c6 = arith.constant 6 : index
    %c0_105 = arith.constant 0 : index
    %c0_106 = arith.constant 0 : index
    %275 = vector.load %arg2[%c6, %c0_105, %c0_106] : memref<8x8x128xf32, #tpu.memory_space<vmem>>, vector<1x8x128xf32>
    %276 = vector.shape_cast %275 : vector<1x8x128xf32> to vector<8x128xf32>
    %cst_107 = arith.constant dense<0.000000e+00> : vector<8x128xf32>
    %277 = tpu.matmul %5, %276, %cst_107 {dimension_numbers = #tpu.dot_dimension_numbers<[1], [0], [0], [1], [0, 0, 1, 1], [], []>} : vector<8x8xf32>, vector<8x128xf32>, vector<8x128xf32> -> vector<8x128xf32>
    %c6_108 = arith.constant 6 : index
    %c0_109 = arith.constant 0 : index
    %c0_110 = arith.constant 0 : index
    %278 = vector.load %arg3[%c6_108, %c0_109, %c0_110] : memref<8x8x128xf32, #tpu.memory_space<vmem>>, vector<1x8x128xf32>
    %279 = vector.shape_cast %278 : vector<1x8x128xf32> to vector<8x128xf32>
    %cst_111 = arith.constant dense<0.000000e+00> : vector<8x128xf32>
    %280 = tpu.matmul %5, %279, %cst_111 {dimension_numbers = #tpu.dot_dimension_numbers<[1], [0], [0], [1], [0, 0, 1, 1], [], []>} : vector<8x8xf32>, vector<8x128xf32>, vector<8x128xf32> -> vector<8x128xf32>
    %cst_112 = arith.constant dense<0xFF800000> : vector<8xf32>
    %281 = vector.multi_reduction <maximumf>, %274, %cst_112 [1] : vector<8x128xf32> to vector<8xf32>
    %282 = vector.shape_cast %281 : vector<8xf32> to vector<8x1xf32>
    %283 = vector.broadcast %282 : vector<8x1xf32> to vector<8x128xf32>
    %284 = arith.subf %274, %283 : vector<8x128xf32>
    %285 = math.exp %284 : vector<8x128xf32>
    %cst_113 = arith.constant dense<0.000000e+00> : vector<8xf32>
    %286 = vector.multi_reduction <add>, %285, %cst_113 [1] : vector<8x128xf32> to vector<8xf32>
    %287 = vector.shape_cast %286 : vector<8xf32> to vector<8x1xf32>
    %288 = vector.broadcast %282 : vector<8x1xf32> to vector<8x128xf32>
    %289 = arith.subf %274, %288 : vector<8x128xf32>
    %290 = math.log %287 : vector<8x1xf32>
    %291 = vector.broadcast %290 : vector<8x1xf32> to vector<8x128xf32>
    %292 = arith.subf %289, %291 : vector<8x128xf32>
    %293 = tpu.reciprocal %287 {approx = true} : vector<8x1xf32> -> vector<8x1xf32>
    %294 = vector.extract_strided_slice %14 {offsets = [0, 6], sizes = [8, 1], strides = [1, 1]} : vector<8x8xf32> to vector<8x1xf32>
    %295 = arith.mulf %277, %292 : vector<8x128xf32>
    %cst_114 = arith.constant dense<0.000000e+00> : vector<8xf32>
    %296 = vector.multi_reduction <add>, %295, %cst_114 [1] : vector<8x128xf32> to vector<8xf32>
    %297 = vector.shape_cast %296 : vector<8xf32> to vector<8x1xf32>
    %298 = arith.subf %294, %297 : vector<8x1xf32>
    %cst_115 = arith.constant 1.000000e+00 : f32
    %299 = vector.broadcast %cst_115 : f32 to vector<8x1xf32>
    %300 = arith.mulf %299, %298 : vector<8x1xf32>
    %cst_116 = arith.constant 5.000000e-01 : f32
    %301 = vector.broadcast %cst_116 : f32 to vector<8x1xf32>
    %302 = arith.mulf %301, %293 : vector<8x1xf32>
    %303 = arith.subf %292, %280 : vector<8x128xf32>
    %304 = arith.mulf %285, %303 : vector<8x128xf32>
    %cst_117 = arith.constant dense<0.000000e+00> : vector<8xf32>
    %305 = vector.multi_reduction <add>, %304, %cst_117 [1] : vector<8x128xf32> to vector<8xf32>
    %306 = vector.shape_cast %305 : vector<8xf32> to vector<8x1xf32>
    %307 = arith.mulf %302, %306 : vector<8x1xf32>
    %308 = vector.extract_strided_slice %12 {offsets = [0, 6], sizes = [8, 1], strides = [1, 1]} : vector<8x8xf32> to vector<8x1xf32>
    %309 = arith.mulf %300, %308 : vector<8x1xf32>
    %310 = arith.addf %273, %309 : vector<8x1xf32>
    %311 = arith.addf %300, %307 : vector<8x1xf32>
    %cst_118 = arith.constant 9.99999974E-6 : f32
    %cst_119 = arith.constant 1.000000e+05 : f32
    %312 = vector.broadcast %cst_118 : f32 to vector<8x1xf32>
    %313 = arith.maximumf %312, %311 : vector<8x1xf32>
    %314 = vector.broadcast %cst_119 : f32 to vector<8x1xf32>
    %315 = arith.minimumf %314, %313 : vector<8x1xf32>
    %316 = arith.addf %310, %315 : vector<8x1xf32>
    %c0_120 = arith.constant 0 : index
    %c896 = arith.constant 896 : index
    %317 = vector.load %arg1[%c0_120, %c896] : memref<8x1024xf32, #tpu.memory_space<vmem>>, vector<8x128xf32>
    %c7 = arith.constant 7 : index
    %c0_121 = arith.constant 0 : index
    %c0_122 = arith.constant 0 : index
    %318 = vector.load %arg2[%c7, %c0_121, %c0_122] : memref<8x8x128xf32, #tpu.memory_space<vmem>>, vector<1x8x128xf32>
    %319 = vector.shape_cast %318 : vector<1x8x128xf32> to vector<8x128xf32>
    %cst_123 = arith.constant dense<0.000000e+00> : vector<8x128xf32>
    %320 = tpu.matmul %5, %319, %cst_123 {dimension_numbers = #tpu.dot_dimension_numbers<[1], [0], [0], [1], [0, 0, 1, 1], [], []>} : vector<8x8xf32>, vector<8x128xf32>, vector<8x128xf32> -> vector<8x128xf32>
    %c7_124 = arith.constant 7 : index
    %c0_125 = arith.constant 0 : index
    %c0_126 = arith.constant 0 : index
    %321 = vector.load %arg3[%c7_124, %c0_125, %c0_126] : memref<8x8x128xf32, #tpu.memory_space<vmem>>, vector<1x8x128xf32>
    %322 = vector.shape_cast %321 : vector<1x8x128xf32> to vector<8x128xf32>
    %cst_127 = arith.constant dense<0.000000e+00> : vector<8x128xf32>
    %323 = tpu.matmul %5, %322, %cst_127 {dimension_numbers = #tpu.dot_dimension_numbers<[1], [0], [0], [1], [0, 0, 1, 1], [], []>} : vector<8x8xf32>, vector<8x128xf32>, vector<8x128xf32> -> vector<8x128xf32>
    %cst_128 = arith.constant dense<0xFF800000> : vector<8xf32>
    %324 = vector.multi_reduction <maximumf>, %317, %cst_128 [1] : vector<8x128xf32> to vector<8xf32>
    %325 = vector.shape_cast %324 : vector<8xf32> to vector<8x1xf32>
    %326 = vector.broadcast %325 : vector<8x1xf32> to vector<8x128xf32>
    %327 = arith.subf %317, %326 : vector<8x128xf32>
    %328 = math.exp %327 : vector<8x128xf32>
    %cst_129 = arith.constant dense<0.000000e+00> : vector<8xf32>
    %329 = vector.multi_reduction <add>, %328, %cst_129 [1] : vector<8x128xf32> to vector<8xf32>
    %330 = vector.shape_cast %329 : vector<8xf32> to vector<8x1xf32>
    %331 = vector.broadcast %325 : vector<8x1xf32> to vector<8x128xf32>
    %332 = arith.subf %317, %331 : vector<8x128xf32>
    %333 = math.log %330 : vector<8x1xf32>
    %334 = vector.broadcast %333 : vector<8x1xf32> to vector<8x128xf32>
    %335 = arith.subf %332, %334 : vector<8x128xf32>
    %336 = tpu.reciprocal %330 {approx = true} : vector<8x1xf32> -> vector<8x1xf32>
    %337 = vector.extract_strided_slice %14 {offsets = [0, 7], sizes = [8, 1], strides = [1, 1]} : vector<8x8xf32> to vector<8x1xf32>
    %338 = arith.mulf %320, %335 : vector<8x128xf32>
    %cst_130 = arith.constant dense<0.000000e+00> : vector<8xf32>
    %339 = vector.multi_reduction <add>, %338, %cst_130 [1] : vector<8x128xf32> to vector<8xf32>
    %340 = vector.shape_cast %339 : vector<8xf32> to vector<8x1xf32>
    %341 = arith.subf %337, %340 : vector<8x1xf32>
    %cst_131 = arith.constant 1.000000e+00 : f32
    %342 = vector.broadcast %cst_131 : f32 to vector<8x1xf32>
    %343 = arith.mulf %342, %341 : vector<8x1xf32>
    %cst_132 = arith.constant 5.000000e-01 : f32
    %344 = vector.broadcast %cst_132 : f32 to vector<8x1xf32>
    %345 = arith.mulf %344, %336 : vector<8x1xf32>
    %346 = arith.subf %335, %323 : vector<8x128xf32>
    %347 = arith.mulf %328, %346 : vector<8x128xf32>
    %cst_133 = arith.constant dense<0.000000e+00> : vector<8xf32>
    %348 = vector.multi_reduction <add>, %347, %cst_133 [1] : vector<8x128xf32> to vector<8xf32>
    %349 = vector.shape_cast %348 : vector<8xf32> to vector<8x1xf32>
    %350 = arith.mulf %345, %349 : vector<8x1xf32>
    %351 = vector.extract_strided_slice %12 {offsets = [0, 7], sizes = [8, 1], strides = [1, 1]} : vector<8x8xf32> to vector<8x1xf32>
    %352 = arith.mulf %343, %351 : vector<8x1xf32>
    %353 = arith.addf %316, %352 : vector<8x1xf32>
    %354 = arith.addf %343, %350 : vector<8x1xf32>
    %cst_134 = arith.constant 9.99999974E-6 : f32
    %cst_135 = arith.constant 1.000000e+05 : f32
    %355 = vector.broadcast %cst_134 : f32 to vector<8x1xf32>
    %356 = arith.maximumf %355, %354 : vector<8x1xf32>
    %357 = vector.broadcast %cst_135 : f32 to vector<8x1xf32>
    %358 = arith.minimumf %357, %356 : vector<8x1xf32>
    %359 = arith.addf %353, %358 : vector<8x1xf32>
    %cst_136 = arith.constant 0.000000e+00 : f32
    %360 = vector.broadcast %cst_136 : f32 to vector<8x1xf32>
    %361 = arith.select %11, %359, %360 : vector<8x1xi1>, vector<8x1xf32>
    %362 = vector.shape_cast %361 : vector<8x1xf32> to vector<1x8x1xf32>
    %cst_137 = arith.constant dense<0.000000e+00> : vector<1xf32>
    %363 = vector.multi_reduction <add>, %362, %cst_137 [1, 2] : vector<1x8x1xf32> to vector<1xf32>
    %364 = vector.shape_cast %363 : vector<1xf32> to vector<1x1x1xf32>
    %365 = vector.extract %364[0, 0, 0] : f32 from vector<1x1x1xf32>
    %366 = vector.broadcast %365 : f32 to vector<1x8x128xf32>
    %c0_138 = arith.constant 0 : index
    %c0_139 = arith.constant 0 : index
    %c0_140 = arith.constant 0 : index
    %367 = vector.load %arg7[%c0_138, %c0_139, %c0_140] : memref<1x8x128xf32, #tpu.memory_space<vmem>>, vector<1x8x128xf32>
    tpu.vector_store %arg7[%c0_138, %c0_139, %c0_140], %366 {strides = array<i32>} : memref<1x8x128xf32, #tpu.memory_space<vmem>>, vector<1x8x128xf32>,
    return
  }
  func.func @transform_0(%arg0: i32) -> (i32, i32) {
    %c0_i32 = arith.constant 0 : i32
    %c0_i32_0 = arith.constant 0 : i32
    return %arg0, %c0_i32 : i32, i32
  }
  func.func @transform_1(%arg0: i32) -> (i32, i32, i32) {
    %c0_i32 = arith.constant 0 : i32
    %c0_i32_0 = arith.constant 0 : i32
    %c0_i32_1 = arith.constant 0 : i32
    %c0_i32_2 = arith.constant 0 : i32
    return %c0_i32, %c0_i32_0, %c0_i32_1 : i32, i32, i32
  }
  func.func @transform_2(%arg0: i32) -> (i32, i32, i32) {
    %c0_i32 = arith.constant 0 : i32
    %c0_i32_0 = arith.constant 0 : i32
    %c0_i32_1 = arith.constant 0 : i32
    %c0_i32_2 = arith.constant 0 : i32
    return %c0_i32, %c0_i32_0, %c0_i32_1 : i32, i32, i32
  }
  func.func @transform_3(%arg0: i32) -> (i32, i32) {
    %c0_i32 = arith.constant 0 : i32
    %c0_i32_0 = arith.constant 0 : i32
    %c0_i32_1 = arith.constant 0 : i32
    return %c0_i32, %c0_i32_0 : i32, i32
  }
  func.func @transform_4(%arg0: i32) -> (i32, i32) {
    %c0_i32 = arith.constant 0 : i32
    %c0_i32_0 = arith.constant 0 : i32
    return %arg0, %c0_i32 : i32, i32
  }
  func.func @transform_5(%arg0: i32) -> (i32, i32) {
    %c0_i32 = arith.constant 0 : i32
    %c0_i32_0 = arith.constant 0 : i32
    return %arg0, %c0_i32 : i32, i32
  }
  func.func @transform_6(%arg0: i32) -> (i32, i32, i32) {
    %c0_i32 = arith.constant 0 : i32
    %c0_i32_0 = arith.constant 0 : i32
    %c0_i32_1 = arith.constant 0 : i32
    return %arg0, %c0_i32, %c0_i32_0 : i32, i32, i32
  }
}

</mosaic_0001>

<bundles_post_ra>
// kernel: hvcm_loss.1
= control target key start
LH: loop header
LB: loop body
LE: loop exit
PB: predicated region body
PF: predicated region fallthrough
CT: control target
= control target key end

     0   :  { %v1774_v0 = vmov 0   ;;  %v1775_v3 = vmov 0.0   ;;  %vm1776_vm0 = vmmov 0   ;;  %v24_v13 = vlaneseq  ;;  %s1777_s20 = smov 127   ;;  %s1780_s21 = smov 124   ;;  %s2138_s4 = inlined_call_operand.vmem [shape: s32[8,1], index: 4, kind: input, shape index: {}]   ;;  %s2139_s0 = inlined_call_operand.vmem [shape: f32[8,1024], index: 0, kind: input, shape index: {}]   ;;  %s2140_s3 = inlined_call_operand.vmem [shape: f32[8,8], index: 3, kind: input, shape index: {}]   ;;  %s2141_s1 = inlined_call_operand.vmem [shape: f32[8,8,128], index: 1, kind: input, shape index: {}]   ;;  %s2142_s2 = inlined_call_operand.vmem [shape: f32[8,8,128], index: 2, kind: input, shape index: {}]   ;;  %s2143_s5 = inlined_call_operand.vmem [shape: f32[8,8], index: 5, kind: input, shape index: {}]   ;;  %s2144_s6 = inlined_call_operand.vmem [shape: f32[1,8,128], index: 6, kind: output, shape index: {}]  }
   0x1   :  { %1725 = vset.pattern.permute.xlu0 %v1774_v0  ;;  %v23_v1 = vld [vmem:[%s2138_s4] sm:$0xff]  ;;  %v1825_v2 = vld [vmem:[%s2139_s0 + $0x10] sm:$0xff]  ;;  %1628 = vmatprep.subr.mxu0 %v1775_v3  ;;  %v1832_v4 = vld [vmem:[%s2139_s0 + $0x18] sm:$0xff]  ;;  %vm40_vm1 = vcmask 64512   ;;  %s1781_s22 = smov 123   ;;  %s1782_s23 = smov 122  }
   0x2   :  { %27 = vperm.xlu0 %1725, %v23_v1   ;;  %609 = vmax.xlane.f32.xlu1 %v1825_v2  ;;  %v39_v5 = vld [vmem:[%s2140_s3] sm:$0xff]  ;;  %v1857_v8 = vld [vmem:[%s2139_s0 + $0x28] sm:$0xff]  ;;  %v1863_v9 = vld [vmem:[%s2139_s0 + $0x30] sm:$0xff]  ;;  %v25_v14 = vand.u32 127, %v24_v13  ;;  %s1783_s24 = smov 121   ;;  %vm1545_vm4 = vcmask 7168  }
   0x3   :  { %1633 = vmatprep.subr.mxu1 %v1775_v3  ;;  %1630 = vmatprep.mubr.msk.f32.mxu0 %vm1776_vm0, %v1775_v3  ;;  %v115_v6 = vld [vmem:[%s2141_s1] sm:$0xff]  ;;  %v1869_v10 = vld [vmem:[%s2139_s0 + $0x38] sm:$0xff]  ;;  %v1881_v12 = vld [vmem:[%s2139_s0 + $0x8] sm:$0xff] }
   0x4   :  { %1635 = vmatprep.mubr.msk.f32.mxu1 %vm1776_vm0, %v1775_v3  ;;  %1629 = vmatpush3.msra.mxu0 %v39_v5  ;;  %v1850_v7 = vld [vmem:[%s2139_s0 + $0x20] sm:$0xff]  ;;  %v1566_v18 = vld [vmem:[%s2141_s1 + $0x8] sm:$0xff]  ;;  %v1570_v20 = vld [vmem:[%s2141_s1 + $0x10] sm:$0xff] }
   0x5   :  { %1634 = vmatpush3.msra.mxu1 %v115_v6  ;;  %1638 = vmatprep.subr.mxu0 %v1775_v3  ;;  %v1875_v11 = vld [vmem:[%s2139_s0] sm:$0xff]  ;;  %v1568_v19 = vld [vmem:[%s2142_s2 + $0x8] sm:$0xff]  ;;  %v1572_v21 = vld [vmem:[%s2142_s2 + $0x10] sm:$0xff]  ;;  %s1779_s0 = smov 125  }
   0x6   :  { %789 = vmax.xlane.f32.xlu1 %v1832_v4  ;;  %1643 = vmatprep.subr.mxu1 %v1775_v3  ;;  %v186_v16 = vld [vmem:[%s2142_s2] sm:$0xff]  ;;  %v1574_v22 = vld [vmem:[%s2141_s1 + $0x18] sm:$0xff]  ;;  %v1582_v28 = vld [vmem:[%s2141_s1 + $0x28] sm:$0xff] }
   0x7   :  { %v1576_v23 = vld [vmem:[%s2142_s2 + $0x18] sm:$0xff]  ;;  %v1578_v25 = vld [vmem:[%s2141_s1 + $0x20] sm:$0xff]  ;;  %v1584_v31 = vld [vmem:[%s2142_s2 + $0x28] sm:$0xff] }
   0x8   :  { %v1580_v26 = vld [vmem:[%s2142_s2 + $0x20] sm:$0xff]  ;;  %v1586_v33 = vld [vmem:[%s2141_s1 + $0x30] sm:$0xff]  ;;  %v1590_v36 = vld [vmem:[%s2141_s1 + $0x38] sm:$0xff] }
   0x9   :  { %v1588_v34 = vld [vmem:[%s2142_s2 + $0x30] sm:$0xff]  ;;  %v1592_v39 = vld [vmem:[%s2142_s2 + $0x38] sm:$0xff] }
   0xa   :  { %969 = vmax.xlane.f32.xlu1 %v1850_v7 }
   0xe   :  { %1149 = vmax.xlane.f32.xlu1 %v1857_v8 }
  0x12   :  { %1329 = vmax.xlane.f32.xlu1 %v1863_v9 }
  0x16   :  { %1509 = vmax.xlane.f32.xlu1 %v1869_v10 }
  0x1a   :  { %257 = vmax.xlane.f32.xlu1 %v1875_v11 }
  0x21   :  { %429 = vmax.xlane.f32.xlu0 %v1881_v12 }
  0x81   :  { %v28_v15 = vpop.permute.xlu0 %27 }
  0x82   :  { %vm29_vm2 = vcmp.eq.s32.totalorder %v28_v15, %v25_v14 }
  0x83   :  { %v1889_v17 = vsel %vm29_vm2, 1.0, %v1775_v3 }
  0x84   :  { %1631 = vmatmul.mubr.msk.f32.vlgmr.msra.gmra.mrb[0].mxu0 %vm40_vm1, %v1889_v17  ;;  %1636 = vmatmul.mubr.msk.f32.vlgmr.msra.gmra.mrb[0].mxu1 %vm40_vm1, %v1889_v17 }
  0x85   :  { %1639 = vmatpush3.msra.mxu0 %v186_v16  ;;  %1640 = vmatprep.mubr.msk.f32.mxu0 %vm1776_vm0, %v1775_v3 }
  0x86   :  { %1644 = vmatpush3.msra.mxu1 %v1566_v18  ;;  %1645 = vmatprep.mubr.msk.f32.mxu1 %vm1776_vm0, %v1775_v3 }
  0x87   :  { %1648 = vmatprep.subr.mxu0 %v1775_v3  ;;  %1653 = vmatprep.subr.mxu1 %v1775_v3 }
  0x88   :  { %1641 = vmatmul.mubr.msk.f32.vlgmr.msra.gmra.mrb[2].mxu0 %vm40_vm1, %v1889_v17  ;;  %1646 = vmatmul.mubr.msk.f32.vlgmr.msra.gmra.mrb[2].mxu1 %vm40_vm1, %v1889_v17 }
  0x89   :  { %1649 = vmatpush3.msra.mxu0 %v1568_v19  ;;  %1650 = vmatprep.mubr.msk.f32.mxu0 %vm1776_vm0, %v1775_v3 }
  0x8a   :  { %1654 = vmatpush3.msra.mxu1 %v1570_v20  ;;  %1655 = vmatprep.mubr.msk.f32.mxu1 %vm1776_vm0, %v1775_v3 }
  0x8b   :  { %1658 = vmatprep.subr.mxu0 %v1775_v3  ;;  %1663 = vmatprep.subr.mxu1 %v1775_v3 }
  0x8c   :  { %1651 = vmatmul.mubr.msk.f32.vlgmr.msra.gmra.mrb[4].mxu0 %vm40_vm1, %v1889_v17  ;;  %1656 = vmatmul.mubr.msk.f32.vlgmr.msra.gmra.mrb[4].mxu1 %vm40_vm1, %v1889_v17 }
  0x8d   :  { %1659 = vmatpush3.msra.mxu0 %v1572_v21  ;;  %1660 = vmatprep.mubr.msk.f32.mxu0 %vm1776_vm0, %v1775_v3 }
  0x8e   :  { %1664 = vmatpush3.msra.mxu1 %v1574_v22  ;;  %1665 = vmatprep.mubr.msk.f32.mxu1 %vm1776_vm0, %v1775_v3 }
  0x8f   :  { %v1937_v24 = vpop.xlane.xlu1 %609  ;;  %1668 = vmatprep.subr.mxu0 %v1775_v3  ;;  %1673 = vmatprep.subr.mxu1 %v1775_v3 }
  0x90   :  { %1661 = vmatmul.mubr.msk.f32.vlgmr.msra.gmra.mrb[6].mxu0 %vm40_vm1, %v1889_v17  ;;  %1666 = vmatmul.mubr.msk.f32.vlgmr.msra.gmra.mrb[6].mxu1 %vm40_vm1, %v1889_v17  ;;  %v611_v46 = vsub.f32 %v1825_v2, %v1937_v24 }
  0x91   :  { %1669 = vmatpush3.msra.mxu0 %v1576_v23  ;;  %1670 = vmatprep.mubr.msk.f32.mxu0 %vm1776_vm0, %v1775_v3 }
  0x92   :  { %1674 = vmatpush3.msra.mxu1 %v1578_v25  ;;  %1675 = vmatprep.mubr.msk.f32.mxu1 %vm1776_vm0, %v1775_v3  ;;  %v612_v49 = vmul.f32 1.442695, %v611_v46 }
  0x93   :  { %v790_v27 = vpop.xlane.xlu1 %789  ;;  %1678 = vmatprep.subr.mxu0 %v1775_v3  ;;  %1683 = vmatprep.subr.mxu1 %v1775_v3 }
  0x94   :  { %v1961_v29 = vsub.f32 %v1832_v4, %v790_v27  ;;  %1671 = vmatmul.mubr.msk.f32.vlgmr.msra.gmra.mrb[8].mxu0 %vm40_vm1, %v1889_v17  ;;  %1676 = vmatmul.mubr.msk.f32.vlgmr.msra.gmra.mrb[8].mxu1 %vm40_vm1, %v1889_v17 }
  0x95   :  { %1679 = vmatpush3.msra.mxu0 %v1580_v26  ;;  %1680 = vmatprep.mubr.msk.f32.mxu0 %vm1776_vm0, %v1775_v3 }
  0x96   :  { %v792_v30 = vmul.f32 1.442695, %v1961_v29  ;;  %1684 = vmatpush3.msra.mxu1 %v1582_v28  ;;  %1685 = vmatprep.mubr.msk.f32.mxu1 %vm1776_vm0, %v1775_v3 }
  0x97   :  { %v970_v32 = vpop.xlane.xlu1 %969  ;;  %1688 = vmatprep.subr.mxu0 %v1775_v3  ;;  %1693 = vmatprep.subr.mxu1 %v1775_v3 }
  0x98   :  { %1726 = vpow2.f32 %v792_v30  ;;  %1681 = vmatmul.mubr.msk.f32.vlgmr.msra.gmra.mrb[10].mxu0 %vm40_vm1, %v1889_v17  ;;  %1686 = vmatmul.mubr.msk.f32.vlgmr.msra.gmra.mrb[10].mxu1 %vm40_vm1, %v1889_v17  ;;  %v2034_v50 = vsub.f32 %v1850_v7, %v970_v32 }
  0x99   :  { %1689 = vmatpush3.msra.mxu0 %v1584_v31  ;;  %1690 = vmatprep.mubr.msk.f32.mxu0 %vm1776_vm0, %v1775_v3 }
  0x9a   :  { %1694 = vmatpush3.msra.mxu1 %v1586_v33  ;;  %1695 = vmatprep.mubr.msk.f32.mxu1 %vm1776_vm0, %v1775_v3  ;;  %v972_v53 = vmul.f32 1.442695, %v2034_v50 }
  0x9b   :  { %v1150_v35 = vpop.xlane.xlu1 %1149  ;;  %1698 = vmatprep.subr.mxu0 %v1775_v3  ;;  %1703 = vmatprep.subr.mxu1 %v1775_v3 }
  0x9c   :  { %v1997_v37 = vsub.f32 %v1857_v8, %v1150_v35  ;;  %1691 = vmatmul.mubr.msk.f32.vlgmr.msra.gmra.mrb[12].mxu0 %vm40_vm1, %v1889_v17  ;;  %1696 = vmatmul.mubr.msk.f32.vlgmr.msra.gmra.mrb[12].mxu1 %vm40_vm1, %v1889_v17 }
  0x9d   :  { %1699 = vmatpush3.msra.mxu0 %v1588_v34  ;;  %1700 = vmatprep.mubr.msk.f32.mxu0 %vm1776_vm0, %v1775_v3 }
  0x9e   :  { %v1152_v38 = vmul.f32 1.442695, %v1997_v37  ;;  %1704 = vmatpush3.msra.mxu1 %v1590_v36  ;;  %1705 = vmatprep.mubr.msk.f32.mxu1 %vm1776_vm0, %v1775_v3 }
  0x9f   :  { %v1330_v40 = vpop.xlane.xlu1 %1329  ;;  %1708 = vmatprep.subr.mxu0 %v1775_v3 }
  0xa0   :  { %1728 = vpow2.f32 %v1152_v38  ;;  %1701 = vmatmul.mubr.msk.f32.vlgmr.msra.gmra.mrb[14].mxu0 %vm40_vm1, %v1889_v17  ;;  %1706 = vmatmul.mubr.msk.f32.vlgmr.msra.gmra.mrb[14].mxu1 %vm40_vm1, %v1889_v17  ;;  %v2041_v54 = vsub.f32 %v1863_v9, %v1330_v40 }
  0xa1   :  { %1709 = vmatpush3.msra.mxu0 %v1592_v39  ;;  %1710 = vmatprep.mubr.msk.f32.mxu0 %vm1776_vm0, %v1775_v3 }
  0xa2   :  { %v2018_v41 = vpop.eup %1726  ;;  %v1332_v56 = vmul.f32 1.442695, %v2041_v54 }
  0xa3   :  { %v1510_v42 = vpop.xlane.xlu1 %1509  ;;  %794 = vadd.xlane.f32.xlu0 %v2018_v41 }
  0xa4   :  { %v2022_v43 = vsub.f32 %v1869_v10, %v1510_v42  ;;  %1711 = vmatmul.mubr.msk.f32.vlgmr.msra.gmra.mrb[16].mxu0 %vm40_vm1, %v1889_v17 }
  0xa6   :  { %v1512_v44 = vmul.f32 1.442695, %v2022_v43 }
  0xa7   :  { %v258_v55 = vpop.xlane.xlu1 %257 }
  0xa8   :  { %1730 = vpow2.f32 %v1512_v44  ;;  %v2045_v57 = vsub.f32 %v1875_v11, %v258_v55 }
  0xaa   :  { %v2027_v45 = vpop.eup %1728  ;;  %v260_v59 = vmul.f32 1.442695, %v2045_v57 }
  0xab   :  { %1154 = vadd.xlane.f32.xlu0 %v2027_v45 }
  0xae   :  { %v430_v47 = vpop.xlane.xlu0 %429 }
  0xaf   :  { %v431_v48 = vsub.f32 %v1881_v12, %v430_v47 }
  0xb1   :  { %v432_v51 = vmul.f32 1.442695, %v431_v48 }
  0xb2   :  { %v2036_v52 = vpop.eup %1730 }
  0xb3   :  { %1732 = vpow2.f32 %v432_v51  ;;  %1514 = vadd.xlane.f32.xlu0 %v2036_v52 }
  0xb4   :  { %1734 = vpow2.f32 %v612_v49 }
  0xb5   :  { %1736 = vpow2.f32 %v972_v53 }
  0xb6   :  { %1738 = vpow2.f32 %v1332_v56 }
  0xb7   :  { %1740 = vpow2.f32 %v260_v59 }
  0xbd   :  { %v1733_v58 = vpop.eup %1732 }
  0xbe   :  { %434 = vadd.xlane.f32.xlu1 %v1733_v58  ;;  %v2048_v60 = vpop.eup %1734 }
  0xbf   :  { %v2051_v61 = vpop.eup %1736 }
  0xc0   :  { %v2054_v62 = vpop.eup %1738 }
  0xc1   :  { %v2057_v63 = vpop.eup %1740 }
  0xc2   :  { %614 = vadd.xlane.f32.xlu1 %v2048_v60 }
  0xc6   :  { %974 = vadd.xlane.f32.xlu1 %v2051_v61 }
  0xca   :  { %1334 = vadd.xlane.f32.xlu1 %v2054_v62 }
  0xce   :  { %262 = vadd.xlane.f32.xlu1 %v2057_v63 }
 0x130   :  { %v2063_v1 = vpop.xlane.xlu0 %794 }
 0x138   :  { %v2072_v5 = vpop.xlane.xlu0 %1154 }
 0x140   :  { %v2084_v23 = vpop.xlane.xlu0 %1514 }
 0x14b   :  { %v2060_v0 = vpop.xlane.xlu1 %434 }
 0x14c   :  { %1742 = vlog2.f32 %v2060_v0 }
 0x14f   :  { %v2065_v2 = vpop.xlane.xlu1 %614 }
 0x150   :  { %1744 = vlog2.f32 %v2065_v2 }
 0x151   :  { %1746 = vlog2.f32 %v2063_v1 }
 0x153   :  { %v2069_v3 = vpop.xlane.xlu1 %974 }
 0x154   :  { %1748 = vlog2.f32 %v2069_v3 }
 0x155   :  { %1750 = vlog2.f32 %v2072_v5 }
 0x156   :  { %v1743_v4 = vpop.eup %1742 }
 0x157   :  { %v2074_v6 = vpop.f32.mrb[0].mxu0  ;;  %v2076_v7 = vpop.f32.mrb[0].mxu1  ;;  %v437_v8 = vmul.f32 0.6931472, %v1743_v4 }
 0x158   :  { %v2078_v9 = vpop.xlane.xlu1 %1334  ;;  %v1632_v10 = vpop.f32.mrb[1].mxu0 }
 0x159   :  { %v1637_v11 = vpop.f32.mrb[1].mxu1  ;;  %v438_v12 = vsub.f32 %v431_v48, %v437_v8  ;;  %1752 = vlog2.f32 %v2078_v9 }
 0x15a   :  { %v1745_v14 = vpop.eup %1744  ;;  %1754 = vlog2.f32 %v2084_v23 }
 0x15b   :  { %v1747_v15 = vpop.eup %1746  ;;  %v2081_v16 = vpop.f32.mrb[2].mxu0  ;;  %v617_v18 = vmul.f32 0.6931472, %v1745_v14 }
 0x15c   :  { %v353_v17 = vpop.f32.mrb[2].mxu1  ;;  %v1642_v20 = vpop.f32.mrb[3].mxu0  ;;  %v797_v25 = vmul.f32 0.6931472, %v1747_v15 }
 0x15d   :  { %v440_v19 = vmul.f32 %v438_v12, %v353_v17  ;;  %v1647_v21 = vpop.f32.mrb[3].mxu1  ;;  %v618_v22 = vsub.f32 %v611_v46, %v617_v18  ;;  %v2086_v24 = vpop.xlane.xlu1 %262 }
 0x15e   :  { %v1749_v26 = vpop.eup %1748  ;;  %v798_v34 = vsub.f32 %v1961_v29, %v797_v25  ;;  %1756 = vlog2.f32 %v2086_v24 }
 0x15f   :  { %441 = vadd.xlane.f32.xlu0 %v440_v19  ;;  %v425_v27 = vpop.f32.mrb[4].mxu0  ;;  %v533_v28 = vpop.f32.mrb[4].mxu1  ;;  %v977_v36 = vmul.f32 0.6931472, %v1749_v26  ;;  %1758 = vrcp.f32 %v2060_v0 }
 0x160   :  { %v445_v30 = vsub.f32 %v438_v12, %v425_v27  ;;  %v620_v31 = vmul.f32 %v618_v22, %v533_v28  ;;  %v1652_v32 = vpop.f32.mrb[5].mxu0  ;;  %v1657_v33 = vpop.f32.mrb[5].mxu1  ;;  %1760 = vrcp.f32 %v2065_v2 }
 0x161   :  { %v1751_v38 = vpop.eup %1750  ;;  %v978_v48 = vsub.f32 %v2034_v50, %v977_v36  ;;  %1762 = vrcp.f32 %v2063_v1 }
 0x162   :  { %v446_v35 = vmul.f32 %v1733_v58, %v445_v30  ;;  %v1157_v51 = vmul.f32 0.6931472, %v1751_v38  ;;  %1764 = vrcp.f32 %v2069_v3 }
 0x163   :  { %621 = vadd.xlane.f32.xlu0 %v620_v31  ;;  %v605_v39 = vpop.f32.mrb[6].mxu0  ;;  %v713_v40 = vpop.f32.mrb[6].mxu1  ;;  %1766 = vrcp.f32 %v2072_v5 }
 0x164   :  { %v625_v42 = vsub.f32 %v618_v22, %v605_v39  ;;  %v800_v44 = vmul.f32 %v798_v34, %v713_v40  ;;  %v1662_v46 = vpop.f32.mrb[7].mxu0  ;;  %v1667_v47 = vpop.f32.mrb[7].mxu1  ;;  %447 = vadd.xlane.f32.xlu1 %v446_v35  ;;  %v1158_v8 = vsub.f32 %v1997_v37, %v1157_v51  ;;  %1768 = vrcp.f32 %v2078_v9 }
 0x165   :  { %v1753_v53 = vpop.eup %1752  ;;  %1770 = vrcp.f32 %v2084_v23 }
 0x166   :  { %v626_v49 = vmul.f32 %v2048_v60, %v625_v42  ;;  %v1337_v11 = vmul.f32 0.6931472, %v1753_v53  ;;  %v1755_v12 = vpop.eup %1754  ;;  %1772 = vrcp.f32 %v2086_v24 }
 0x167   :  { %801 = vadd.xlane.f32.xlu0 %v800_v44  ;;  %v785_v29 = vpop.f32.mrb[8].mxu0  ;;  %v893_v55 = vpop.f32.mrb[8].mxu1  ;;  %v1517_v22 = vmul.f32 0.6931472, %v1755_v12 }
 0x168   :  { %v805_v56 = vsub.f32 %v798_v34, %v785_v29  ;;  %v980_v58 = vmul.f32 %v978_v48, %v893_v55  ;;  %v1672_v59 = vpop.f32.mrb[9].mxu0  ;;  %v1677_v4 = vpop.f32.mrb[9].mxu1  ;;  %627 = vadd.xlane.f32.xlu1 %v626_v49  ;;  %v1338_v20 = vsub.f32 %v2041_v54, %v1337_v11 }
 0x169   :  { %v1757_v19 = vpop.eup %1756  ;;  %v1518_v31 = vsub.f32 %v2022_v43, %v1517_v22 }
 0x16a   :  { %v806_v10 = vmul.f32 %v2018_v41, %v805_v56  ;;  %v265_v26 = vmul.f32 0.6931472, %v1757_v19 }
 0x16b   :  { %981 = vadd.xlane.f32.xlu0 %v980_v58  ;;  %v965_v14 = vpop.f32.mrb[10].mxu0  ;;  %v1073_v50 = vpop.f32.mrb[10].mxu1 }
 0x16c   :  { %v985_v15 = vsub.f32 %v978_v48, %v965_v14  ;;  %v1160_v60 = vmul.f32 %v1158_v8, %v1073_v50  ;;  %v1682_v17 = vpop.f32.mrb[11].mxu0  ;;  %v1687_v18 = vpop.f32.mrb[11].mxu1  ;;  %807 = vadd.xlane.f32.xlu1 %v806_v10  ;;  %v266_v38 = vsub.f32 %v2045_v57, %v265_v26  ;;  %v2111_v57 = vld [vmem:[%s2143_s5] sm:$0xff]  ;;  %s1778_s5 = smov 126  }
 0x16e   :  { %v986_v21 = vmul.f32 %v2051_v61, %v985_v15  ;;  %v268_v43 = vmul.f32 %v266_v38, %v2076_v7  ;;  %v273_v46 = vsub.f32 %v266_v38, %v2081_v16  ;;  %v1759_v7 = vpop.eup %1758 }
 0x16f   :  { %1161 = vadd.xlane.f32.xlu0 %v1160_v60  ;;  %v1145_v25 = vpop.f32.mrb[12].mxu0  ;;  %v1253_v37 = vpop.f32.mrb[12].mxu1  ;;  %v444_v0 = vmul.f32 0.5, %v1759_v7 }
 0x170   :  { %v1165_v41 = vsub.f32 %v1158_v8, %v1145_v25  ;;  %v1340_v27 = vmul.f32 %v1338_v20, %v1253_v37  ;;  %v1692_v28 = vpop.f32.mrb[13].mxu0  ;;  %v1697_v30 = vpop.f32.mrb[13].mxu1  ;;  %987 = vadd.xlane.f32.xlu1 %v986_v21  ;;  %v274_v47 = vmul.f32 %v2057_v63, %v273_v46 }
 0x171   :  { %v1761_v2 = vpop.eup %1760 }
 0x172   :  { %v1166_v32 = vmul.f32 %v2027_v45, %v1165_v41  ;;  %v624_v53 = vmul.f32 0.5, %v1761_v2  ;;  %v1763_v29 = vpop.eup %1762 }
 0x173   :  { %1341 = vadd.xlane.f32.xlu0 %v1340_v27  ;;  %v1325_v33 = vpop.f32.mrb[14].mxu0  ;;  %v1433_v34 = vpop.f32.mrb[14].mxu1  ;;  %v804_v10 = vmul.f32 0.5, %v1763_v29 }
 0x174   :  { %v1345_v35 = vsub.f32 %v1338_v20, %v1325_v33  ;;  %v1520_v54 = vmul.f32 %v1518_v31, %v1433_v34  ;;  %v1702_v36 = vpop.f32.mrb[15].mxu0  ;;  %v1707_v61 = vpop.f32.mrb[15].mxu1  ;;  %1167 = vadd.xlane.f32.xlu1 %v1166_v32 }
 0x175   :  { %v1765_v11 = vpop.eup %1764 }
 0x176   :  { %v1346_v39 = vmul.f32 %v2054_v62, %v1345_v35  ;;  %v984_v19 = vmul.f32 0.5, %v1765_v11  ;;  %v1767_v9 = vpop.eup %1766 }
 0x177   :  { %1521 = vadd.xlane.f32.xlu0 %v1520_v54  ;;  %v1505_v40 = vpop.f32.mrb[16].mxu0  ;;  %v1164_v27 = vmul.f32 0.5, %v1767_v9  ;;  %v1769_v28 = vpop.eup %1768 }
 0x178   :  { %v1525_v42 = vsub.f32 %v1518_v31, %v1505_v40  ;;  %v1712_v44 = vpop.f32.mrb[17].mxu0  ;;  %1347 = vadd.xlane.f32.xlu1 %v1346_v39  ;;  %v1771_v35 = vpop.eup %1770  ;;  %v1344_v61 = vmul.f32 0.5, %v1769_v28  ;;  %v33_v28 = vshrl.u32 %v24_v13, 7 }
 0x17a   :  { %v1526_v45 = vmul.f32 %v2036_v52, %v1525_v42  ;;  %vm37_vm3 = vcmp.lt.s32.totalorder %v33_v28, 4 }
 0x17b   :  { %269 = vadd.xlane.f32.xlu0 %v268_v43  ;;  %v1524_v43 = vmul.f32 0.5, %v1771_v35 }
 0x17c   :  { %1527 = vadd.xlane.f32.xlu1 %v1526_v45 }
 0x180   :  { %275 = vadd.xlane.f32.xlu1 %v274_v47 }
 0x1ec   :  { %v442_v62 = vpop.xlane.xlu0 %441 }
 0x1ed   :  { %v443_v52 = vsub.f32 %v2074_v6, %v442_v62 }
 0x1ef   :  { %v450_v16 = vmul.f32 %v443_v52, %v2111_v57 }
 0x1f0   :  { %v622_v63 = vpop.xlane.xlu0 %621 }
 0x1f1   :  { %452 = vrot.lane.b32.xlu0 %v450_v16, %s1777_s20  ;;  %v448_v48 = vpop.xlane.xlu1 %447  ;;  %v623_v56 = vsub.f32 %v2074_v6, %v622_v63 }
 0x1f2   :  { %v449_v1 = vmul.f32 %v448_v48, %v444_v0 }
 0x1f3   :  { %v630_v60 = vmul.f32 %v623_v56, %v2111_v57 }
 0x1f4   :  { %v802_v49 = vpop.xlane.xlu0 %801  ;;  %v456_v51 = vadd.f32 %v449_v1, %v443_v52  ;;  %v1773_v52 = vpop.eup %1772 }
 0x1f5   :  { %v628_v55 = vpop.xlane.xlu1 %627  ;;  %v803_v5 = vsub.f32 %v2074_v6, %v802_v49 }
 0x1f6   :  { %v457_v58 = vmax.f32 %v456_v51, 1e-05  ;;  %v629_v59 = vmul.f32 %v628_v55, %v624_v53  ;;  %v272_v51 = vmul.f32 0.5, %v1773_v52 }
 0x1f7   :  { %v810_v37 = vmul.f32 %v803_v5, %v2111_v57 }
 0x1f8   :  { %v982_v3 = vpop.xlane.xlu0 %981  ;;  %v458_v4 = vmin.f32 %v457_v58, 100000.0  ;;  %v636_v8 = vadd.f32 %v629_v59, %v623_v56 }
 0x1f9   :  { %v808_v12 = vpop.xlane.xlu1 %807  ;;  %v983_v21 = vsub.f32 %v2074_v6, %v982_v3 }
 0x1fa   :  { %v637_v14 = vmax.f32 %v636_v8, 1e-05  ;;  %v809_v50 = vmul.f32 %v808_v12, %v804_v10  ;;  %460 = vrot.lane.b32.xlu1 %v458_v4, %s1777_s20 }
 0x1fb   :  { %v990_v54 = vmul.f32 %v983_v21, %v2111_v57 }
 0x1fc   :  { %v1162_v15 = vpop.xlane.xlu0 %1161  ;;  %v638_v17 = vmin.f32 %v637_v14, 100000.0  ;;  %v816_v18 = vadd.f32 %v809_v50, %v803_v5 }
 0x1fd   :  { %v988_v20 = vpop.xlane.xlu1 %987  ;;  %v1163_v31 = vsub.f32 %v2074_v6, %v1162_v15 }
 0x1fe   :  { %v817_v22 = vmax.f32 %v816_v18, 1e-05  ;;  %v989_v25 = vmul.f32 %v988_v20, %v984_v19  ;;  %632 = vrot.lane.b32.xlu1 %v630_v60, %s1778_s5  ;;  %640 = vrot.lane.b32.xlu0 %v638_v17, %s1778_s5 }
 0x1ff   :  { %v1170_v45 = vmul.f32 %v1163_v31, %v2111_v57 }
 0x200   :  { %v1342_v23 = vpop.xlane.xlu0 %1341  ;;  %v818_v26 = vmin.f32 %v817_v22, 100000.0  ;;  %v996_v41 = vadd.f32 %v989_v25, %v983_v21 }
 0x201   :  { %v1168_v30 = vpop.xlane.xlu1 %1167  ;;  %v1343_v39 = vsub.f32 %v2074_v6, %v1342_v23 }
 0x202   :  { %v997_v32 = vmax.f32 %v996_v41, 1e-05  ;;  %v1169_v33 = vmul.f32 %v1168_v30, %v1164_v27  ;;  %812 = vrot.lane.b32.xlu1 %v810_v37, %s1779_s0  ;;  %820 = vrot.lane.b32.xlu0 %v818_v26, %s1779_s0 }
 0x203   :  { %v1350_v48 = vmul.f32 %v1343_v39, %v2111_v57 }
 0x204   :  { %v1522_v34 = vpop.xlane.xlu0 %1521  ;;  %v998_v24 = vmin.f32 %v997_v32, 100000.0  ;;  %v1176_v36 = vadd.f32 %v1169_v33, %v1163_v31 }
 0x205   :  { %v1348_v38 = vpop.xlane.xlu1 %1347  ;;  %v1523_v16 = vsub.f32 %v2074_v6, %v1522_v34 }
 0x206   :  { %v1177_v40 = vmax.f32 %v1176_v36, 1e-05  ;;  %v1349_v42 = vmul.f32 %v1348_v38, %v1344_v61  ;;  %992 = vrot.lane.b32.xlu1 %v990_v54, %s1780_s21  ;;  %1000 = vrot.lane.b32.xlu0 %v998_v24, %s1780_s21 }
 0x208   :  { %v270_v44 = vpop.xlane.xlu0 %269  ;;  %v1178_v46 = vmin.f32 %v1177_v40, 100000.0  ;;  %v1356_v47 = vadd.f32 %v1349_v42, %v1343_v39 }
 0x209   :  { %v271_v62 = vsub.f32 %v2074_v6, %v270_v44  ;;  %v1528_v7 = vpop.xlane.xlu1 %1527  ;;  %v1530_v6 = vmul.f32 %v1523_v16, %v2111_v57 }
 0x20a   :  { %v1357_v63 = vmax.f32 %v1356_v47, 1e-05  ;;  %v1529_v2 = vmul.f32 %v1528_v7, %v1524_v43  ;;  %1172 = vrot.lane.b32.xlu1 %v1170_v45, %s1781_s22  ;;  %1180 = vrot.lane.b32.xlu0 %v1178_v46, %s1781_s22 }
 0x20b   :  { %v278_v0 = vmul.f32 %v271_v62, %v2111_v57 }
 0x20c   :  { %v1358_v1 = vmin.f32 %v1357_v63, 100000.0  ;;  %v1536_v49 = vadd.f32 %v1529_v2, %v1523_v16 }
 0x20d   :  { %v276_v53 = vpop.xlane.xlu1 %275 }
 0x20e   :  { %v1537_v29 = vmax.f32 %v1536_v49, 1e-05  ;;  %v277_v55 = vmul.f32 %v276_v53, %v272_v51  ;;  %1352 = vrot.lane.b32.xlu1 %v1350_v48, %s1782_s23  ;;  %1360 = vrot.lane.b32.xlu0 %v1358_v1, %s1782_s23 }
 0x210   :  { %v1538_v56 = vmin.f32 %v1537_v29, 100000.0  ;;  %v280_v58 = vadd.f32 %v277_v55, %v271_v62 }
 0x212   :  { %v281_v59 = vmax.f32 %v280_v58, 1e-05  ;;  %1532 = vrot.lane.b32.xlu1 %v1530_v6, %s1783_s24  ;;  %1540 = vrot.lane.b32.xlu0 %v1538_v56, %s1783_s24 }
 0x214   :  { %v282_v3 = vmin.f32 %v281_v59, 100000.0 }
 0x216   :  { %v283_v4 = vadd.f32 %v282_v3, %v278_v0 }
 0x263   :  { %v453_v8 = vpop.permute.xlu0 %452 }
 0x264   :  { %v455_v11 = vadd.f32 %v453_v8, %v283_v4 }
 0x26c   :  { %v461_v10 = vpop.permute.xlu1 %460 }
 0x26d   :  { %v463_v12 = vadd.f32 %v461_v10, %v455_v11 }
 0x270   :  { %v641_v5 = vpop.permute.xlu0 %640  ;;  %v633_v14 = vpop.permute.xlu1 %632 }
 0x271   :  { %v635_v50 = vadd.f32 %v633_v14, %v463_v12 }
 0x273   :  { %v643_v15 = vadd.f32 %v641_v5, %v635_v50 }
 0x274   :  { %v821_v60 = vpop.permute.xlu0 %820  ;;  %v813_v17 = vpop.permute.xlu1 %812 }
 0x275   :  { %v815_v18 = vadd.f32 %v813_v17, %v643_v15 }
 0x277   :  { %v823_v57 = vadd.f32 %v821_v60, %v815_v18 }
 0x278   :  { %v1001_v19 = vpop.permute.xlu0 %1000  ;;  %v993_v9 = vpop.permute.xlu1 %992 }
 0x279   :  { %v995_v20 = vadd.f32 %v993_v9, %v823_v57 }
 0x27b   :  { %v1003_v21 = vadd.f32 %v1001_v19, %v995_v20 }
 0x27c   :  { %v1181_v22 = vpop.permute.xlu0 %1180  ;;  %v1173_v25 = vpop.permute.xlu1 %1172 }
 0x27d   :  { %v1175_v23 = vadd.f32 %v1173_v25, %v1003_v21 }
 0x27f   :  { %v1183_v37 = vadd.f32 %v1181_v22, %v1175_v23 }
 0x280   :  { %v1361_v26 = vpop.permute.xlu0 %1360  ;;  %v1353_v41 = vpop.permute.xlu1 %1352 }
 0x281   :  { %v1355_v27 = vadd.f32 %v1353_v41, %v1183_v37 }
 0x283   :  { %v1363_v30 = vadd.f32 %v1361_v26, %v1355_v27 }
 0x284   :  { %v1533_v31 = vpop.permute.xlu1 %1532  ;;  %v1541_v33 = vpop.permute.xlu0 %1540 }
 0x285   :  { %v1535_v32 = vadd.f32 %v1533_v31, %v1363_v30 }
 0x287   :  { %v1543_v34 = vadd.f32 %v1541_v33, %v1535_v32 }
 0x289   :  { %v1544_v35 = vsel %vm37_vm3, %v1543_v34, 0.0 }
 0x28a   :  { %v1546_v54 = vsel %vm1545_vm4, %v1544_v35, 0.0 }
 0x28b   :  { %1547 = vadd.xlane.f32.xlu1 %v1546_v54 }
 0x318   :  { %v1548_v24 = vpop.xlane.xlu1 %1547 }
 0x319   :  { %v1549_v36 = vrot.slane %v1548_v24, 4 }
 0x31b   :  { %v1550_v61 = vadd.f32 %v1549_v36, %v1548_v24 }
 0x31d   :  { %v1551_v38 = vrot.slane %v1550_v61, 2 }
 0x31f   :  { %v1552_v39 = vadd.f32 %v1551_v38, %v1550_v61 }
 0x321   :  { %v1553_v40 = vrot.slane %v1552_v39, 1 }
 0x323   :  { %v1554_v42 = vadd.f32 %v1553_v40, %v1552_v39 }
 0x325   :  { %1713 = vpush %v1554_v42 }
 0x356   :  { %s1714_s25 = spop %1713 }
 0x357   :  { %v1556_v13 = vstv %s1714_s25 }
 0x358   :  { %1557 = vst [vmem:[%s2144_s6] sm:$0xff] %v1556_v13 }

</bundles_post_ra>
